<compile_context>
chip_gen: v7x
topology: tpu7x:2x2x1
jax: 0.10.0
libtpu: 0.0.40
codegen_flags: <defaults>
</compile_context>

<pallas_src>
import functools

import jax
import jax.numpy as jnp
from jax import lax
from jax.experimental import pallas as pl
from jax.experimental.pallas import tpu as pltpu


_SUB_ROWS = 32  # inner fold granularity; keeps temporaries vreg-sized and
                # satisfies the sublane minimum of every dtype (f32/bf16/int8).


def _pit_mae_kernel(s1p_ref, s2p_ref, s1_ref, s2_ref, out_ref):
    s = pl.program_id(1)  # reduction axis (last, "arbitrary")

    @pl.when(s == 0)
    def _():
        out_ref[...] = jnp.zeros_like(out_ref)

    rows, lane_w = s1p_ref.shape
    n_sub = rows // _SUB_ROWS

    def body(i, carry):
        acc_same, acc_swap = carry
        r0 = pl.multiple_of(i * _SUB_ROWS, _SUB_ROWS)
        s1p = s1p_ref[pl.ds(r0, _SUB_ROWS), :].astype(jnp.float32)
        s2p = s2p_ref[pl.ds(r0, _SUB_ROWS), :].astype(jnp.float32)
        s1 = s1_ref[pl.ds(r0, _SUB_ROWS), :].astype(jnp.float32)
        s2 = s2_ref[pl.ds(r0, _SUB_ROWS), :].astype(jnp.float32)
        # Only two partial sums are needed: the epilogue only ever uses the
        # pairwise sums (|s1p-s1|+|s2p-s2|) and (|s1p-s2|+|s2p-s1|).
        d_same = jnp.abs(s1p - s1) + jnp.abs(s2p - s2)
        d_swap = jnp.abs(s1p - s2) + jnp.abs(s2p - s1)
        # Pure-VPU sublane fold into (8, lane_w) running sums.
        acc_same = acc_same + jnp.sum(
            d_same.reshape(_SUB_ROWS // 8, 8, lane_w), axis=0)
        acc_swap = acc_swap + jnp.sum(
            d_swap.reshape(_SUB_ROWS // 8, 8, lane_w), axis=0)
        return acc_same, acc_swap

    zero = jnp.zeros((8, lane_w), jnp.float32)
    acc_same, acc_swap = lax.fori_loop(
        0, n_sub, body, (zero, zero), unroll=(n_sub <= 8))

    # Output block is resident across the reduction axis -> accumulate in place.
    out_ref[0:8, :] += acc_same
    out_ref[8:16, :] += acc_swap


def _select_config():
    """Per-generation tiling defaults based on trace-time VMEM capacity."""
    vmem_bytes = None
    try:
        info = pltpu.get_tpu_info()
        vmem_bytes = getattr(info, "vmem_capacity_bytes", None)
    except Exception:
        vmem_bytes = None
    if vmem_bytes is not None and vmem_bytes < 96 * 1024 * 1024:
        # v7x-class part: 64 MiB VMEM per TensorCore, 2 TensorCores.
        # Keep num_splits=2 so the "parallel" axis shards rows across cores.
        return dict(lane_w=512, tile_rows=1024, num_splits=2,
                    vmem_limit_bytes=40 * 1024 * 1024)
    # v5e / v6e: 128 MiB VMEM, single TensorCore -> one big stream.
    return dict(lane_w=512, tile_rows=2048, num_splits=1,
                vmem_limit_bytes=64 * 1024 * 1024)


def _fit_tiling(n_elems, lane_w, tile_rows, num_splits):
    """Shrink the tiling so at least one full chunk fits inside n_elems."""
    lane_w = max(128, (lane_w // 128) * 128)
    tile_rows = max(_SUB_ROWS, (tile_rows // _SUB_ROWS) * _SUB_ROWS)

    def chunk():
        return num_splits * tile_rows * lane_w

    if chunk() > n_elems and num_splits > 1:
        num_splits = 1
    while chunk() > n_elems and tile_rows > _SUB_ROWS:
        tile_rows = max(_SUB_ROWS, (tile_rows // 2) // _SUB_ROWS * _SUB_ROWS)
    while chunk() > n_elems and lane_w > 128:
        lane_w = max(128, (lane_w // 2) // 128 * 128)
    if chunk() > n_elems:
        return None
    return lane_w, tile_rows, num_splits


@functools.partial(
    jax.jit,
    static_argnames=("lane_w", "tile_rows", "num_splits", "vmem_limit_bytes"))
def _mae_wav_loss_impl(s1_pred, s2_pred, s1, s2, *, lane_w, tile_rows,
                       num_splits, vmem_limit_bytes):
    n = s1_pred.size
    chunk_elems = num_splits * tile_rows * lane_w
    steps = n // chunk_elems            # >= 1 by construction (see _fit_tiling)
    bulk = steps * chunk_elems
    rows = num_splits * steps * tile_rows

    flats = [jnp.ravel(a) for a in (s1_pred, s2_pred, s1, s2)]
    if bulk == n:
        # Pure metadata reshape of a contiguous array: no copy.
        blocks = [f.reshape(rows, lane_w) for f in flats]
    else:
        # Prefix slice + reshape; `allow_input_fusion` lets XLA fuse this into
        # the pallas_call's input DMA instead of materializing a padded copy.
        blocks = [f[:bulk].reshape(rows, lane_w) for f in flats]

    in_spec = pl.BlockSpec((tile_rows, lane_w),
                           lambda p, s: (p * steps + s, 0))
    # Per-split output slab: rows [16p, 16p+8) = "same" perm,
    # rows [16p+8, 16p+16) = "swapped" perm.
    out_spec = pl.BlockSpec((16, lane_w), lambda p, s: (p, 0))

    itemsize = jnp.dtype(s1_pred.dtype).itemsize
    cost = pl.CostEstimate(
        flops=12 * bulk,
        transcendentals=0,
        bytes_accessed=4 * bulk * itemsize + num_splits * 16 * lane_w * 4,
    )

    partials = pl.pallas_call(
        _pit_mae_kernel,
        out_shape=jax.ShapeDtypeStruct((num_splits * 16, lane_w), jnp.float32),
        grid_spec=pltpu.PrefetchScalarGridSpec(
            num_scalar_prefetch=0,
            grid=(num_splits, steps),
            in_specs=[in_spec] * 4,
            out_specs=out_spec,
        ),
        compiler_params=pltpu.CompilerParams(
            dimension_semantics=("parallel", "arbitrary"),
            vmem_limit_bytes=vmem_limit_bytes,
            allow_input_fusion=[True, True, True, True],
        ),
        cost_estimate=cost,
    )(*blocks)

    # (num_splits*16, lane_w) -> (num_splits, 2, 8, lane_w) -> (2,)
    sums = partials.reshape(num_splits, 2, 8, lane_w).sum(axis=(0, 2, 3))

    if bulk != n:
        # Ragged tail (< one chunk): one fused XLA reduction, reads each tail
        # exactly once -> no traffic amplification.
        t1p, t2p, t1, t2 = [f[bulk:].astype(jnp.float32) for f in flats]
        tail_same = jnp.sum(jnp.abs(t1p - t1)) + jnp.sum(jnp.abs(t2p - t2))
        tail_swap = jnp.sum(jnp.abs(t1p - t2)) + jnp.sum(jnp.abs(t2p - t1))
        sums = sums + jnp.stack([tail_same, tail_swap])

    inv = 1.0 / (2.0 * jnp.float32(n))
    loss_perm_1 = sums[0] * inv     # (L1(s1p,s1) + L1(s2p,s2)) / 2
    loss_perm_2 = sums[1] * inv     # (L1(s1p,s2) + L1(s2p,s1)) / 2
    return jnp.minimum(loss_perm_1, loss_perm_2)


@jax.jit
def _mae_pit_jax(s1_pred, s2_pred, s1, s2):
    """Pure-JAX PIT-MAE (tiny-input fallback and verification reference)."""
    def l1(a, b):
        return jnp.mean(jnp.abs(a.astype(jnp.float32) - b.astype(jnp.float32)))
    p1 = (l1(s1_pred, s1) + l1(s2_pred, s2)) / 2.0
    p2 = (l1(s1_pred, s2) + l1(s2_pred, s1)) / 2.0
    return jnp.minimum(p1, p2)


def mae_wav_loss(s1_pred, s2_pred, s1, s2, *, lane_w=None, tile_rows=None,
                 num_splits=None, vmem_limit_bytes=None):
    """PIT MAE loss over two sources. All inputs have shape (B, T)."""
    assert s1_pred.shape == s2_pred.shape == s1.shape == s2.shape
    assert s1_pred.dtype == s2_pred.dtype == s1.dtype == s2.dtype

    cfg = _select_config()
    if lane_w is not None:
        cfg["lane_w"] = lane_w
    if tile_rows is not None:
        cfg["tile_rows"] = tile_rows
    if num_splits is not None:
        cfg["num_splits"] = num_splits
    if vmem_limit_bytes is not None:
        cfg["vmem_limit_bytes"] = vmem_limit_bytes

    n = s1_pred.size
    fit = _fit_tiling(n, cfg["lane_w"], cfg["tile_rows"], cfg["num_splits"])
    if fit is None:
        # Smaller than one (32, 128) tile: kernel overhead would dominate.
        return {"loss": _mae_pit_jax(s1_pred, s2_pred, s1, s2)}

    lw, tr, ns = fit
    loss = _mae_wav_loss_impl(s1_pred, s2_pred, s1, s2, lane_w=lw, tile_rows=tr,
                              num_splits=ns,
                              vmem_limit_bytes=cfg["vmem_limit_bytes"])
    return {"loss": loss}


if __name__ == "__main__":
    # Small synthetic waveforms: 2 utterances of 1 second at 16 kHz.
    B, T = 2, 16000
    key = jax.random.PRNGKey(0)
    k1, k2, k3, k4 = jax.random.split(key, 4)
    s1_pred = jax.random.normal(k1, (B, T), dtype=jnp.float32)
    s2_pred = jax.random.normal(k2, (B, T), dtype=jnp.float32)
    s1 = jax.random.normal(k3, (B, T), dtype=jnp.float32)
    s2 = jax.random.normal(k4, (B, T), dtype=jnp.float32)

    out = mae_wav_loss(s1_pred, s2_pred, s1, s2)
    loss = jax.block_until_ready(out["loss"])

    ref = jax.block_until_ready(_mae_pit_jax(s1_pred, s2_pred, s1, s2))
    assert jnp.allclose(loss, ref, rtol=1e-4, atol=1e-6), (loss, ref)

    print("KERNEL_OK")
</pallas_src>

<mosaic_0001>
module attributes {stable_mosaic.version = 11 : i64} {
  func.func @_pit_mae_kernel(%arg0: i32, %arg1: i32, %arg2: memref<32x512xf32, #tpu.memory_space<vmem>>, %arg3: memref<32x512xf32, #tpu.memory_space<vmem>>, %arg4: memref<32x512xf32, #tpu.memory_space<vmem>>, %arg5: memref<32x512xf32, #tpu.memory_space<vmem>>, %arg6: memref<16x512xf32, #tpu.memory_space<vmem>>) attributes {dimension_semantics = [#tpu.dimension_semantics<parallel>, #tpu.dimension_semantics<arbitrary>], iteration_bounds = array<i64: 1, 1>, scalar_prefetch = 0 : i64, scratch_operands = 0 : i64, tpu.core_type = #tpu.core_type<tc>, window_params = [{transform_indices = @transform_0, window_bounds = array<i64: 32, 512>}, {transform_indices = @transform_1, window_bounds = array<i64: 32, 512>}, {transform_indices = @transform_2, window_bounds = array<i64: 32, 512>}, {transform_indices = @transform_3, window_bounds = array<i64: 32, 512>}, {transform_indices = @transform_4, window_bounds = array<i64: 16, 512>}]} {
    %c0_i32 = arith.constant 0 : i32
    %0 = arith.cmpi eq, %arg1, %c0_i32 : i32
    %1 = arith.extui %0 : i1 to i32
    %c0_i32_0 = arith.constant 0 : i32
    %2 = arith.cmpi ne, %1, %c0_i32_0 : i32
    scf.if %2 {
      %cst_14 = arith.constant 0.000000e+00 : f32
      %36 = vector.broadcast %cst_14 : f32 to vector<16x512xf32>
      %c0_15 = arith.constant 0 : index
      %c0_16 = arith.constant 0 : index
      %37 = vector.load %arg6[%c0_15, %c0_16] : memref<16x512xf32, #tpu.memory_space<vmem>>, vector<16x512xf32>
      tpu.vector_store %arg6[%c0_15, %c0_16], %36 {strides = array<i32>} : memref<16x512xf32, #tpu.memory_space<vmem>>, vector<16x512xf32>,
    } else {
    }
    %cst = arith.constant 0.000000e+00 : f32
    %3 = vector.broadcast %cst : f32 to vector<8x512xf32>
    %c0_i32_1 = arith.constant 0 : i32
    %c32_i32 = arith.constant 32 : i32
    %4 = arith.muli %c0_i32_1, %c32_i32 : i32
    %5 = tpu.assume_multiple %4, 32 : i32
    %6 = arith.index_cast %5 : i32 to index
    %c0 = arith.constant 0 : index
    %7 = vector.load %arg2[%6, %c0] : memref<32x512xf32, #tpu.memory_space<vmem>>, vector<32x512xf32>
    %8 = arith.index_cast %5 : i32 to index
    %c0_2 = arith.constant 0 : index
    %9 = vector.load %arg3[%8, %c0_2] : memref<32x512xf32, #tpu.memory_space<vmem>>, vector<32x512xf32>
    %10 = arith.index_cast %5 : i32 to index
    %c0_3 = arith.constant 0 : index
    %11 = vector.load %arg4[%10, %c0_3] : memref<32x512xf32, #tpu.memory_space<vmem>>, vector<32x512xf32>
    %12 = arith.index_cast %5 : i32 to index
    %c0_4 = arith.constant 0 : index
    %13 = vector.load %arg5[%12, %c0_4] : memref<32x512xf32, #tpu.memory_space<vmem>>, vector<32x512xf32>
    %14 = arith.subf %7, %11 : vector<32x512xf32>
    %15 = math.absf %14 : vector<32x512xf32>
    %16 = arith.subf %9, %13 : vector<32x512xf32>
    %17 = math.absf %16 : vector<32x512xf32>
    %18 = arith.addf %15, %17 : vector<32x512xf32>
    %19 = arith.subf %7, %13 : vector<32x512xf32>
    %20 = math.absf %19 : vector<32x512xf32>
    %21 = arith.subf %9, %11 : vector<32x512xf32>
    %22 = math.absf %21 : vector<32x512xf32>
    %23 = arith.addf %20, %22 : vector<32x512xf32>
    %24 = vector.shape_cast %18 : vector<32x512xf32> to vector<4x8x512xf32>
    %cst_5 = arith.constant dense<0.000000e+00> : vector<8x512xf32>
    %25 = vector.multi_reduction <add>, %24, %cst_5 [0] : vector<4x8x512xf32> to vector<8x512xf32>
    %26 = arith.addf %3, %25 : vector<8x512xf32>
    %27 = vector.shape_cast %23 : vector<32x512xf32> to vector<4x8x512xf32>
    %cst_6 = arith.constant dense<0.000000e+00> : vector<8x512xf32>
    %28 = vector.multi_reduction <add>, %27, %cst_6 [0] : vector<4x8x512xf32> to vector<8x512xf32>
    %29 = arith.addf %3, %28 : vector<8x512xf32>
    %c1_i32 = arith.constant 1 : i32
    %c0_7 = arith.constant 0 : index
    %c0_8 = arith.constant 0 : index
    %30 = vector.load %arg6[%c0_7, %c0_8] : memref<16x512xf32, #tpu.memory_space<vmem>>, vector<8x512xf32>
    %31 = arith.addf %30, %26 : vector<8x512xf32>
    %c0_9 = arith.constant 0 : index
    %c0_10 = arith.constant 0 : index
    %32 = vector.load %arg6[%c0_9, %c0_10] : memref<16x512xf32, #tpu.memory_space<vmem>>, vector<8x512xf32>
    tpu.vector_store %arg6[%c0_9, %c0_10], %31 {strides = array<i32>} : memref<16x512xf32, #tpu.memory_space<vmem>>, vector<8x512xf32>,
    %c8 = arith.constant 8 : index
    %c0_11 = arith.constant 0 : index
    %33 = vector.load %arg6[%c8, %c0_11] : memref<16x512xf32, #tpu.memory_space<vmem>>, vector<8x512xf32>
    %34 = arith.addf %33, %29 : vector<8x512xf32>
    %c8_12 = arith.constant 8 : index
    %c0_13 = arith.constant 0 : index
    %35 = vector.load %arg6[%c8_12, %c0_13] : memref<16x512xf32, #tpu.memory_space<vmem>>, vector<8x512xf32>
    tpu.vector_store %arg6[%c8_12, %c0_13], %34 {strides = array<i32>} : memref<16x512xf32, #tpu.memory_space<vmem>>, vector<8x512xf32>,
    return
  }
  func.func @transform_0(%arg0: i32, %arg1: i32) -> (i32, i32) {
    %c1_i32 = arith.constant 1 : i32
    %0 = arith.muli %arg0, %c1_i32 : i32
    %1 = arith.addi %0, %arg1 : i32
    %c0_i32 = arith.constant 0 : i32
    %c0_i32_0 = arith.constant 0 : i32
    return %1, %c0_i32 : i32, i32
  }
  func.func @transform_1(%arg0: i32, %arg1: i32) -> (i32, i32) {
    %c1_i32 = arith.constant 1 : i32
    %0 = arith.muli %arg0, %c1_i32 : i32
    %1 = arith.addi %0, %arg1 : i32
    %c0_i32 = arith.constant 0 : i32
    %c0_i32_0 = arith.constant 0 : i32
    return %1, %c0_i32 : i32, i32
  }
  func.func @transform_2(%arg0: i32, %arg1: i32) -> (i32, i32) {
    %c1_i32 = arith.constant 1 : i32
    %0 = arith.muli %arg0, %c1_i32 : i32
    %1 = arith.addi %0, %arg1 : i32
    %c0_i32 = arith.constant 0 : i32
    %c0_i32_0 = arith.constant 0 : i32
    return %1, %c0_i32 : i32, i32
  }
  func.func @transform_3(%arg0: i32, %arg1: i32) -> (i32, i32) {
    %c1_i32 = arith.constant 1 : i32
    %0 = arith.muli %arg0, %c1_i32 : i32
    %1 = arith.addi %0, %arg1 : i32
    %c0_i32 = arith.constant 0 : i32
    %c0_i32_0 = arith.constant 0 : i32
    return %1, %c0_i32 : i32, i32
  }
  func.func @transform_4(%arg0: i32, %arg1: i32) -> (i32, i32) {
    %c0_i32 = arith.constant 0 : i32
    %c0_i32_0 = arith.constant 0 : i32
    return %arg0, %c0_i32 : i32, i32
  }
}

</mosaic_0001>

<bundles_post_ra>
// kernel: _mae_wav_loss_impl.1
= control target key start
LH: loop header
LB: loop body
LE: loop exit
PB: predicated region body
PF: predicated region fallthrough
CT: control target
= control target key end

     0   :  { %9 = vsyncpa [#allocation3], 0  ;;  %s940_s0 = inlined_call_operand.hbm [shape: f32[32,512], index: 0, kind: input, shape index: {}]   ;;  %s941_s1 = inlined_call_operand.hbm [shape: f32[32,512], index: 1, kind: input, shape index: {}]   ;;  %s942_s2 = inlined_call_operand.hbm [shape: f32[32,512], index: 2, kind: input, shape index: {}]   ;;  %s943_s3 = inlined_call_operand.hbm [shape: f32[32,512], index: 3, kind: input, shape index: {}]   ;;  %s944_s4 = inlined_call_operand.hbm [shape: f32[16,512], index: 4, kind: output, shape index: {}]  }
   0x1   :  { %10 = vsyncpa [#allocation6], 0 }
   0x2   :  { %11 = vsyncpa [#allocation9], 0 }
   0x3   :  { %12 = vsyncpa [#allocation4], 0  ;;  %s547_s15 = smov [#allocation5]   ;;  %s548_s17 = smov [#allocation2]  }
   0x4   :  { %s40_s16 = sshll.u32 %s547_s15, 4  ;;  %s23_s18 = sshll.u32 %s548_s17, 4  ;;  %s41_s16 = int_to_ptr.vmem [resolvable:$true] %s40_s16  ;;  %s579_s18 = int_to_ptr.vmem [resolvable:$true] %s23_s18 }
   0x5   :  { %s429_s21 = scalar_lea.hbm %s941_s1, 2048 }
   0x6   :  { %p430_p0 = scmp.ne.s32.totalorder %s941_s1, %s429_s21  ;;  %p433_p1 = scmp.lt.u32.totalorder %s429_s21, %s941_s1 }
   0x8   :  { %p435_p2 = pnand %p433_p1, %p430_p0 }
   0xa   :  { %438 = shalt.err (!%p435_p2)
}
   0xb   :  { %s439_s26 = scalar_lea.vmem %s41_s16, 2048  ;;  %p444_p4 = scmp.lt.s32.totalorder %s41_s16, %s41_s16 }
   0xc   :  { %p440_p3 = scmp.ne.s32.totalorder %s41_s16, %s439_s26  ;;  %p445_p5 = scmp.lt.s32.totalorder %s439_s26, %s439_s26 }
   0xe   :  { %p446_p6 = por %p445_p5, %p444_p4 }
  0x10   :  { %p447_p7 = pnand %p446_p6, %p440_p3 }
  0x12   :  { %450 = shalt.err (!%p447_p7)
}
  0x13   :  { %s549_s27 = smov 512   ;;  %s550_s28 = smov 32  }
  0x14   :  { %46 = dma.hbm_to_vmem [thread:$0]  %s941_s1, 2048, %s41_s16, [#allocation6], %s549_s27, %s549_s27, %s550_s28  }
  0x15   :  { %s451_s7 = scalar_lea.hbm %s940_s0, 2048 }
  0x16   :  { %p452_p8 = scmp.ne.s32.totalorder %s940_s0, %s451_s7  ;;  %p455_p9 = scmp.lt.u32.totalorder %s451_s7, %s940_s0 }
  0x18   :  { %p457_p10 = pnand %p455_p9, %p452_p8 }
  0x1a   :  { %460 = shalt.err (!%p457_p10)
}
  0x1b   :  { %s461_s12 = scalar_lea.vmem %s579_s18, 2048  ;;  %p466_p12 = scmp.lt.s32.totalorder %s579_s18, %s579_s18 }
  0x1c   :  { %p462_p11 = scmp.ne.s32.totalorder %s579_s18, %s461_s12  ;;  %p467_p13 = scmp.lt.s32.totalorder %s461_s12, %s461_s12 }
  0x1e   :  { %p468_p0 = por %p467_p13, %p466_p12 }
  0x20   :  { %p469_p1 = pnand %p468_p0, %p462_p11 }
  0x22   :  { %472 = shalt.err (!%p469_p1)
}
  0x23   :  { %29 = dma.hbm_to_vmem [thread:$0]  %s940_s0, 2048, %s579_s18, [#allocation3], %s549_s27, %s549_s27, %s550_s28  }
  0x24   :  { %s551_s14 = smov [#allocation7]   ;;  %s552_s16 = smov [#allocation8]  }
  0x25   :  { %s57_s15 = sshll.u32 %s551_s14, 4  ;;  %s74_s17 = sshll.u32 %s552_s16, 4  ;;  %s58_s15 = int_to_ptr.vmem [resolvable:$true] %s57_s15  ;;  %s616_s17 = int_to_ptr.vmem [resolvable:$true] %s74_s17 }
  0x26   :  { %s473_s21 = scalar_lea.hbm %s942_s2, 2048 }
  0x27   :  { %p474_p2 = scmp.ne.s32.totalorder %s942_s2, %s473_s21  ;;  %p477_p3 = scmp.lt.u32.totalorder %s473_s21, %s942_s2 }
  0x29   :  { %p479_p4 = pnand %p477_p3, %p474_p2 }
  0x2b   :  { %482 = shalt.err (!%p479_p4)
}
  0x2c   :  { %s483_s0 = scalar_lea.vmem %s58_s15, 2048  ;;  %p488_p6 = scmp.lt.s32.totalorder %s58_s15, %s58_s15 }
  0x2d   :  { %p484_p5 = scmp.ne.s32.totalorder %s58_s15, %s483_s0  ;;  %p489_p7 = scmp.lt.s32.totalorder %s483_s0, %s483_s0 }
  0x2f   :  { %p490_p8 = por %p489_p7, %p488_p6 }
  0x31   :  { %p491_p9 = pnand %p490_p8, %p484_p5 }
  0x33   :  { %494 = shalt.err (!%p491_p9)
}
  0x34   :  { %63 = dma.hbm_to_vmem [thread:$0]  %s942_s2, 2048, %s58_s15, [#allocation6], %s549_s27, %s549_s27, %s550_s28  }
  0x35   :  { %s495_s5 = scalar_lea.hbm %s943_s3, 2048 }
  0x36   :  { %p496_p10 = scmp.ne.s32.totalorder %s943_s3, %s495_s5  ;;  %p499_p11 = scmp.lt.u32.totalorder %s495_s5, %s943_s3 }
  0x38   :  { %p501_p12 = pnand %p499_p11, %p496_p10 }
  0x3a   :  { %504 = shalt.err (!%p501_p12)
}
  0x3b   :  { %s505_s10 = scalar_lea.vmem %s616_s17, 2048  ;;  %p510_p0 = scmp.lt.s32.totalorder %s616_s17, %s616_s17 }
  0x3c   :  { %p506_p13 = scmp.ne.s32.totalorder %s616_s17, %s505_s10  ;;  %p511_p1 = scmp.lt.s32.totalorder %s505_s10, %s505_s10 }
  0x3e   :  { %p512_p2 = por %p511_p1, %p510_p0 }
  0x40   :  { %p513_p3 = pnand %p512_p2, %p506_p13 }
  0x42   :  { %516 = shalt.err (!%p513_p3)
}
  0x43   :  { %80 = dma.hbm_to_vmem [thread:$0]  %s943_s3, 2048, %s616_s17, [#allocation9], %s549_s27, %s549_s27, %s550_s28  }
  0x44   :  { %539 = dma.done.wait [#allocation3], 2048  }
  0x45   :  { %540 = vsyncadd [#allocation3], 4294965248 }
  0x46   :  { %541 = dma.done.wait [#allocation6], 4096  }
  0x47   :  { %542 = vsyncadd [#allocation6], 4294963200 }
  0x48   :  { %543 = dma.done.wait [#allocation9], 2048  }
  0x49   :  { %544 = vsyncadd [#allocation9], 4294965248  ;;  %v116_v0 = vld [vmem:[#allocation2] sm:$0xff]  ;;  %v690_v30 = vld [vmem:[#allocation2 + $0x8] sm:$0xff]  ;;  %s553_s3 = smov [#allocation10]  }
  0x4a   :  { %v120_v1 = vld [vmem:[#allocation2 + $0x20] sm:$0xff]  ;;  %v692_v31 = vld [vmem:[#allocation2 + $0x28] sm:$0xff]  ;;  %v813_v20 = vld [vmem:[#allocation2 + $0x58] sm:$0xff]  ;;  %s407_s12 = sshll.u32 %s553_s3, 4  ;;  %s408_s12 = int_to_ptr.vmem [resolvable:$true] %s407_s12 }
  0x4b   :  { %v653_v2 = vld [vmem:[#allocation2 + $0x40] sm:$0xff]  ;;  %v694_v37 = vld [vmem:[#allocation2 + $0x48] sm:$0xff]  ;;  %s517_s1 = scalar_lea.vmem %s408_s12, 1024  ;;  %p522_p5 = scmp.lt.s32.totalorder %s408_s12, %s408_s12 }
  0x4c   :  { %v655_v3 = vld [vmem:[#allocation2 + $0x60] sm:$0xff]  ;;  %v696_v38 = vld [vmem:[#allocation2 + $0x68] sm:$0xff]  ;;  %p518_p4 = scmp.ne.s32.totalorder %s408_s12, %s517_s1  ;;  %p523_p6 = scmp.lt.s32.totalorder %s517_s1, %s517_s1 }
  0x4d   :  { %v657_v4 = vld [vmem:[#allocation5] sm:$0xff]  ;;  %v698_v39 = vld [vmem:[#allocation5 + $0x8] sm:$0xff] }
  0x4e   :  { %v659_v5 = vld [vmem:[#allocation5 + $0x20] sm:$0xff]  ;;  %v703_v46 = vld [vmem:[#allocation5 + $0x28] sm:$0xff]  ;;  %p524_p7 = por %p523_p6, %p522_p5 }
  0x4f   :  { %v661_v6 = vld [vmem:[#allocation5 + $0x40] sm:$0xff]  ;;  %v705_v47 = vld [vmem:[#allocation5 + $0x48] sm:$0xff] }
  0x50   :  { %v663_v7 = vld [vmem:[#allocation5 + $0x60] sm:$0xff]  ;;  %v707_v48 = vld [vmem:[#allocation5 + $0x68] sm:$0xff]  ;;  %p525_p8 = pnand %p524_p7, %p518_p4 }
  0x51   :  { %v665_v8 = vld [vmem:[#allocation7] sm:$0xff]  ;;  %v711_v51 = vld [vmem:[#allocation7 + $0x8] sm:$0xff] }
  0x52   :  { %v667_v9 = vld [vmem:[#allocation7 + $0x20] sm:$0xff]  ;;  %v186_v12 = vsub.f32 %v116_v0, %v665_v8  ;;  %v713_v52 = vld [vmem:[#allocation7 + $0x28] sm:$0xff]  ;;  %v187_v61 = vsub.f32 %v690_v30, %v711_v51 }
  0x53   :  { %v669_v10 = vld [vmem:[#allocation7 + $0x40] sm:$0xff]  ;;  %v190_v17 = vsub.f32 %v120_v1, %v667_v9  ;;  %v715_v53 = vld [vmem:[#allocation7 + $0x48] sm:$0xff]  ;;  %v191_v62 = vsub.f32 %v692_v31, %v713_v52 }
  0x54   :  { %v671_v11 = vld [vmem:[#allocation7 + $0x60] sm:$0xff]  ;;  %v194_v18 = vsub.f32 %v653_v2, %v669_v10  ;;  %v202_v22 = vand.u32 2147483647, %v186_v12  ;;  %v723_v58 = vld [vmem:[#allocation7 + $0x68] sm:$0xff]  ;;  %v195_v63 = vsub.f32 %v694_v37, %v715_v53 }
  0x55   :  { %v170_v14 = vld [vmem:[#allocation8] sm:$0xff]  ;;  %v198_v19 = vsub.f32 %v655_v3, %v671_v11  ;;  %v206_v26 = vand.u32 2147483647, %v190_v17  ;;  %v725_v59 = vld [vmem:[#allocation8 + $0x8] sm:$0xff]  ;;  %v207_v17 = vand.u32 2147483647, %v191_v62 }
  0x56   :  { %v174_v15 = vld [vmem:[#allocation8 + $0x20] sm:$0xff]  ;;  %v218_v23 = vsub.f32 %v657_v4, %v170_v14  ;;  %v210_v27 = vand.u32 2147483647, %v194_v18  ;;  %v266_v35 = vsub.f32 %v116_v0, %v170_v14  ;;  %v727_v60 = vld [vmem:[#allocation8 + $0x28] sm:$0xff]  ;;  %v211_v18 = vand.u32 2147483647, %v195_v63 }
  0x57   :  { %v178_v16 = vld [vmem:[#allocation8 + $0x40] sm:$0xff]  ;;  %v222_v24 = vsub.f32 %v659_v5, %v174_v15  ;;  %v214_v28 = vand.u32 2147483647, %v198_v19  ;;  %v270_v40 = vsub.f32 %v120_v1, %v174_v15  ;;  %v735_v0 = vld [vmem:[#allocation8 + $0x48] sm:$0xff]  ;;  %v223_v12 = vsub.f32 %v703_v46, %v727_v60  ;;  %v747_v19 = vld [vmem:[#allocation2 + $0x10] sm:$0xff] }
  0x58   :  { %v683_v21 = vld [vmem:[#allocation8 + $0x60] sm:$0xff]  ;;  %v226_v25 = vsub.f32 %v661_v6, %v178_v16  ;;  %v234_v32 = vand.u32 2147483647, %v218_v23  ;;  %v274_v41 = vsub.f32 %v653_v2, %v178_v16  ;;  %v709_v49 = vand.u32 2147483647, %v266_v35  ;;  %v737_v1 = vld [vmem:[#allocation8 + $0x68] sm:$0xff] }
  0x59   :  { %v230_v29 = vsub.f32 %v663_v7, %v683_v21  ;;  %v238_v33 = vand.u32 2147483647, %v222_v24  ;;  %v278_v42 = vsub.f32 %v655_v3, %v683_v21  ;;  %v717_v54 = vand.u32 2147483647, %v270_v40  ;;  %v777_v62 = vld [vmem:[#allocation7 + $0x50] sm:$0xff] }
  0x5a   :  { %v242_v34 = vand.u32 2147483647, %v226_v25  ;;  %v250_v43 = vadd.f32 %v234_v32, %v202_v22  ;;  %v199_v2 = vsub.f32 %v696_v38, %v723_v58  ;;  %v219_v3 = vsub.f32 %v698_v39, %v725_v59  ;;  %v753_v25 = vld [vmem:[#allocation2 + $0x30] sm:$0xff]  ;;  %966 = vst [vmem:[#allocation21_spill] sm:$0xff] %v777_v62 }
  0x5b   :  { %v246_v36 = vand.u32 2147483647, %v230_v29  ;;  %v254_v44 = vadd.f32 %v238_v33, %v206_v26  ;;  %v745_v14 = vand.u32 2147483647, %v274_v41  ;;  %v203_v16 = vand.u32 2147483647, %v187_v61 }
  0x5c   :  { %v258_v45 = vadd.f32 %v242_v34, %v210_v27  ;;  %v215_v21 = vand.u32 2147483647, %v199_v2  ;;  %v227_v22 = vsub.f32 %v705_v47, %v735_v0  ;;  %v231_v23 = vsub.f32 %v707_v48, %v737_v1  ;;  %v755_v26 = vld [vmem:[#allocation2 + $0x50] sm:$0xff] }
  0x5d   :  { %v262_v50 = vadd.f32 %v246_v36, %v214_v28  ;;  %v346_v57 = vadd.f32 %v254_v44, %v250_v43  ;;  %v235_v24 = vand.u32 2147483647, %v219_v3  ;;  %v239_v28 = vand.u32 2147483647, %v223_v12  ;;  %v757_v29 = vld [vmem:[#allocation2 + $0x70] sm:$0xff] }
  0x5e   :  { %v759_v32 = vld [vmem:[#allocation5 + $0x10] sm:$0xff]  ;;  %v243_v36 = vand.u32 2147483647, %v227_v22  ;;  %v247_v40 = vand.u32 2147483647, %v231_v23 }
  0x5f   :  { %v347_v15 = vadd.f32 %v346_v57, %v258_v45  ;;  %960 = vst [vmem:[#allocation15_spill] sm:$0xff] %v759_v32  ;;  %v761_v33 = vld [vmem:[#allocation5 + $0x30] sm:$0xff]  ;;  %v251_v41 = vadd.f32 %v235_v24, %v203_v16  ;;  %v779_v63 = vand.u32 2147483647, %v278_v42 }
  0x60   :  { %961 = vst [vmem:[#allocation16_spill] sm:$0xff] %v761_v33  ;;  %v767_v43 = vld [vmem:[#allocation5 + $0x50] sm:$0xff]  ;;  %v259_v3 = vadd.f32 %v243_v36, %v211_v18  ;;  %v263_v12 = vadd.f32 %v247_v40, %v215_v21  ;;  %v196_v18 = vsub.f32 %v755_v26, %v777_v62 }
  0x61   :  { %v348_v27 = vadd.f32 %v347_v15, %v262_v50  ;;  %962 = vst [vmem:[#allocation17_spill] sm:$0xff] %v767_v43  ;;  %v769_v44 = vld [vmem:[#allocation5 + $0x70] sm:$0xff]  ;;  %v255_v50 = vadd.f32 %v239_v28, %v207_v17 }
  0x62   :  { %963 = vst [vmem:[#allocation18_spill] sm:$0xff] %v769_v44  ;;  %v773_v57 = vld [vmem:[#allocation7 + $0x10] sm:$0xff]  ;;  %v212_v34 = vand.u32 2147483647, %v196_v18  ;;  %v825_v18 = vld [vmem:[#allocation5 + $0x78] sm:$0xff] }
  0x63   :  { %964 = vst [vmem:[#allocation19_spill] sm:$0xff] %v773_v57  ;;  %v775_v61 = vld [vmem:[#allocation7 + $0x30] sm:$0xff]  ;;  %v188_v17 = vsub.f32 %v747_v19, %v773_v57  ;;  %386 = vst [vmem:[#allocation10] sm:$0xff] %v348_v27  ;;  %v349_v42 = vadd.f32 %v255_v50, %v251_v41  ;;  %v807_v41 = vld [vmem:[#allocation2 + $0x18] sm:$0xff] }
  0x64   :  { %965 = vst [vmem:[#allocation20_spill] sm:$0xff] %v775_v61  ;;  %v783_v15 = vld [vmem:[#allocation7 + $0x70] sm:$0xff]  ;;  %v192_v23 = vsub.f32 %v753_v25, %v775_v61  ;;  %v809_v50 = vld [vmem:[#allocation2 + $0x38] sm:$0xff] }
  0x65   :  { %967 = vst [vmem:[#allocation22_spill] sm:$0xff] %v783_v15  ;;  %v785_v16 = vld [vmem:[#allocation8 + $0x10] sm:$0xff]  ;;  %v200_v21 = vsub.f32 %v757_v29, %v783_v15  ;;  %v204_v40 = vand.u32 2147483647, %v188_v17  ;;  %v350_v35 = vadd.f32 %v349_v42, %v259_v3  ;;  %v815_v17 = vld [vmem:[#allocation2 + $0x78] sm:$0xff] }
  0x66   :  { %v787_v22 = vld [vmem:[#allocation8 + $0x30] sm:$0xff]  ;;  %v220_v36 = vsub.f32 %v759_v32, %v785_v16  ;;  %v208_v2 = vand.u32 2147483647, %v192_v23  ;;  %v817_v23 = vld [vmem:[#allocation5 + $0x18] sm:$0xff] }
  0x67   :  { %v793_v24 = vld [vmem:[#allocation8 + $0x50] sm:$0xff]  ;;  %v224_v45 = vsub.f32 %v761_v33, %v787_v22  ;;  %v216_v56 = vand.u32 2147483647, %v200_v21  ;;  %968 = vst [vmem:[#allocation23_spill] sm:$0xff] %v817_v23  ;;  %v351_v33 = vadd.f32 %v350_v35, %v263_v12  ;;  %v821_v3 = vld [vmem:[#allocation5 + $0x38] sm:$0xff]  ;;  %v303_v21 = vsub.f32 %v703_v46, %v713_v52 }
  0x68   :  { %v795_v28 = vld [vmem:[#allocation8 + $0x70] sm:$0xff]  ;;  %v228_v27 = vsub.f32 %v767_v43, %v793_v24  ;;  %v236_v13 = vand.u32 2147483647, %v220_v36  ;;  %v299_v43 = vsub.f32 %v698_v39, %v711_v51  ;;  %969 = vst [vmem:[#allocation24_spill] sm:$0xff] %v821_v3  ;;  %v823_v42 = vld [vmem:[#allocation5 + $0x58] sm:$0xff] }
  0x69   :  { %v232_v55 = vsub.f32 %v769_v44, %v795_v28  ;;  %v240_v15 = vand.u32 2147483647, %v224_v45  ;;  %970 = vst [vmem:[#allocation25_spill] sm:$0xff] %v823_v42  ;;  %v307_v44 = vsub.f32 %v705_v47, %v715_v53  ;;  %v831_v32 = vld [vmem:[#allocation7 + $0x18] sm:$0xff]  ;;  %387 = vst [vmem:[#allocation10 + $0x8] sm:$0xff] %v351_v33 }
  0x6a   :  { %v244_v62 = vand.u32 2147483647, %v228_v27  ;;  %v252_v36 = vadd.f32 %v236_v13, %v204_v40  ;;  %971 = vst [vmem:[#allocation26_spill] sm:$0xff] %v831_v32  ;;  %v833_v39 = vld [vmem:[#allocation7 + $0x38] sm:$0xff]  ;;  %v189_v13 = vsub.f32 %v807_v41, %v831_v32 }
  0x6b   :  { %v248_v61 = vand.u32 2147483647, %v232_v55  ;;  %v256_v45 = vadd.f32 %v240_v15, %v208_v2  ;;  %972 = vst [vmem:[#allocation27_spill] sm:$0xff] %v833_v39  ;;  %v835_v51 = vld [vmem:[#allocation7 + $0x58] sm:$0xff]  ;;  %v974_v55 = vsub.f32 %v657_v4, %v665_v8  ;;  %v193_v47 = vsub.f32 %v809_v50, %v833_v39 }
  0x6c   :  { %v260_v27 = vadd.f32 %v244_v62, %v212_v34  ;;  %973 = vst [vmem:[#allocation28_spill] sm:$0xff] %v835_v51  ;;  %v840_v57 = vld [vmem:[#allocation7 + $0x78] sm:$0xff]  ;;  %v197_v4 = vsub.f32 %v813_v20, %v835_v51 }
  0x6d   :  { %v314_v35 = vand.u32 2147483647, %v974_v55  ;;  %v264_v12 = vadd.f32 %v248_v61, %v216_v56  ;;  %975 = vst [vmem:[#allocation29_spill] sm:$0xff] %v840_v57  ;;  %v842_v46 = vld [vmem:[#allocation8 + $0x18] sm:$0xff]  ;;  %v352_v53 = vadd.f32 %v256_v45, %v252_v36  ;;  %v201_v8 = vsub.f32 %v815_v17, %v840_v57 }
  0x6e   :  { %v844_v52 = vld [vmem:[#allocation8 + $0x38] sm:$0xff]  ;;  %v221_v56 = vsub.f32 %v817_v23, %v842_v46  ;;  %v205_v61 = vand.u32 2147483647, %v189_v13  ;;  %v209_v2 = vand.u32 2147483647, %v193_v47  ;;  %v976_v47 = vsub.f32 %v659_v5, %v667_v9 }
  0x6f   :  { %v850_v34 = vld [vmem:[#allocation8 + $0x58] sm:$0xff]  ;;  %v225_v15 = vsub.f32 %v821_v3, %v844_v52  ;;  %v353_v36 = vadd.f32 %v352_v53, %v260_v27  ;;  %v213_v45 = vand.u32 2147483647, %v197_v4  ;;  %v217_v55 = vand.u32 2147483647, %v201_v8 }
  0x70   :  { %v852_v62 = vld [vmem:[#allocation8 + $0x78] sm:$0xff]  ;;  %v229_v40 = vsub.f32 %v823_v42, %v850_v34  ;;  %v237_v39 = vand.u32 2147483647, %v221_v56  ;;  %v330_v23 = vadd.f32 %v314_v35, %v709_v49  ;;  %v318_v3 = vand.u32 2147483647, %v976_v47  ;;  %v988_v47 = vld [vmem:[#allocation17_spill] sm:$0xff] }
  0x71   :  { %v233_v51 = vsub.f32 %v825_v18, %v852_v62  ;;  %v241_v57 = vand.u32 2147483647, %v225_v15  ;;  %v354_v33 = vadd.f32 %v353_v36, %v264_v12  ;;  %v977_v42 = vsub.f32 %v661_v6, %v669_v10  ;;  %v984_v36 = vld [vmem:[#allocation15_spill] sm:$0xff] }
  0x72   :  { %v245_v32 = vand.u32 2147483647, %v229_v40  ;;  %v253_v53 = vadd.f32 %v237_v39, %v205_v61  ;;  %v978_v56 = vsub.f32 %v663_v7, %v671_v11  ;;  %v334_v49 = vadd.f32 %v318_v3, %v717_v54 }
  0x73   :  { %v249_v13 = vand.u32 2147483647, %v233_v51  ;;  %v322_v27 = vand.u32 2147483647, %v977_v42  ;;  %v257_v4 = vadd.f32 %v241_v57, %v209_v2  ;;  %v979_v9 = vsub.f32 %v690_v30, %v725_v59  ;;  %388 = vst [vmem:[#allocation10 + $0x10] sm:$0xff] %v354_v33 }
  0x74   :  { %v261_v8 = vadd.f32 %v245_v32, %v213_v45  ;;  %v326_v15 = vand.u32 2147483647, %v978_v56  ;;  %v980_v10 = vsub.f32 %v692_v31, %v727_v60  ;;  %v362_v57 = vadd.f32 %v334_v49, %v330_v23  ;;  %v985_v45 = vld [vmem:[#allocation20_spill] sm:$0xff] }
  0x75   :  { %v265_v40 = vadd.f32 %v249_v13, %v217_v55  ;;  %v338_v51 = vadd.f32 %v322_v27, %v745_v14  ;;  %v355_v35 = vadd.f32 %v257_v4, %v253_v53  ;;  %v283_v6 = vand.u32 2147483647, %v979_v9  ;;  %v986_v55 = vld [vmem:[#allocation16_spill] sm:$0xff]  ;;  %v987_v13 = vld [vmem:[#allocation21_spill] sm:$0xff] }
  0x76   :  { %v342_v5 = vadd.f32 %v326_v15, %v779_v63  ;;  %v287_v32 = vand.u32 2147483647, %v980_v10  ;;  %v981_v7 = vsub.f32 %v694_v37, %v735_v0  ;;  %v982_v54 = vsub.f32 %v696_v38, %v737_v1 }
  0x77   :  { %v311_v63 = vsub.f32 %v707_v48, %v723_v58  ;;  %v356_v3 = vadd.f32 %v355_v35, %v261_v8  ;;  %v315_v30 = vand.u32 2147483647, %v299_v43  ;;  %v319_v59 = vand.u32 2147483647, %v303_v21 }
  0x78   :  { %v291_v11 = vand.u32 2147483647, %v981_v7  ;;  %v295_v14 = vand.u32 2147483647, %v982_v54  ;;  %v323_v42 = vand.u32 2147483647, %v307_v44  ;;  %v363_v39 = vadd.f32 %v362_v57, %v338_v51 }
  0x79   :  { %v327_v31 = vand.u32 2147483647, %v311_v63  ;;  %v268_v60 = vsub.f32 %v747_v19, %v785_v16  ;;  %v272_v37 = vsub.f32 %v753_v25, %v787_v22  ;;  %v357_v0 = vadd.f32 %v356_v3, %v265_v40  ;;  %v983_v16 = vld [vmem:[#allocation19_spill] sm:$0xff]  ;;  %v996_v54 = vld [vmem:[#allocation25_spill] sm:$0xff] }
  0x7a   :  { %v331_v23 = vadd.f32 %v315_v30, %v283_v6  ;;  %v335_v12 = vadd.f32 %v319_v59, %v287_v32  ;;  %v339_v38 = vadd.f32 %v323_v42, %v291_v11  ;;  %v364_v1 = vadd.f32 %v363_v39, %v342_v5  ;;  %v995_v11 = vld [vmem:[#allocation28_spill] sm:$0xff]  ;;  %v997_v63 = vld [vmem:[#allocation29_spill] sm:$0xff] }
  0x7b   :  { %v343_v61 = vadd.f32 %v327_v31, %v295_v14  ;;  %v276_v48 = vsub.f32 %v755_v26, %v793_v24  ;;  %v280_v58 = vsub.f32 %v757_v29, %v795_v28  ;;  %v284_v44 = vand.u32 2147483647, %v268_v60  ;;  %389 = vst [vmem:[#allocation10 + $0x18] sm:$0xff] %v357_v0  ;;  %v989_v26 = vld [vmem:[#allocation22_spill] sm:$0xff] }
  0x7c   :  { %v365_v43 = vadd.f32 %v335_v12, %v331_v23  ;;  %v288_v21 = vand.u32 2147483647, %v272_v37  ;;  %v300_v25 = vsub.f32 %v984_v36, %v983_v16  ;;  %v304_v33 = vsub.f32 %v986_v55, %v985_v45  ;;  %v990_v24 = vld [vmem:[#allocation18_spill] sm:$0xff]  ;;  %398 = vst [vmem:[#allocation10 + $0x20] sm:$0xff] %v364_v1 }
  0x7d   :  { %v292_v2 = vand.u32 2147483647, %v276_v48  ;;  %v296_v19 = vand.u32 2147483647, %v280_v58  ;;  %v308_v27 = vsub.f32 %v988_v47, %v987_v13  ;;  %v312_v53 = vsub.f32 %v990_v24, %v989_v26 }
  0x7e   :  { %v366_v22 = vadd.f32 %v365_v43, %v339_v38  ;;  %v316_v29 = vand.u32 2147483647, %v300_v25  ;;  %v269_v28 = vsub.f32 %v807_v41, %v842_v46  ;;  %v273_v4 = vsub.f32 %v809_v50, %v844_v52  ;;  %v991_v41 = vld [vmem:[#allocation26_spill] sm:$0xff]  ;;  %v992_v46 = vld [vmem:[#allocation23_spill] sm:$0xff]  ;;  %v994_v52 = vld [vmem:[#allocation24_spill] sm:$0xff] }
  0x7f   :  { %v277_v8 = vsub.f32 %v813_v20, %v850_v34  ;;  %v320_v15 = vand.u32 2147483647, %v304_v33  ;;  %v324_v40 = vand.u32 2147483647, %v308_v27  ;;  %v328_v49 = vand.u32 2147483647, %v312_v53 }
  0x80   :  { %v367_v56 = vadd.f32 %v366_v22, %v343_v61  ;;  %v332_v51 = vadd.f32 %v316_v29, %v284_v44  ;;  %v281_v35 = vsub.f32 %v815_v17, %v852_v62  ;;  %v285_v6 = vand.u32 2147483647, %v269_v28  ;;  %v993_v50 = vld [vmem:[#allocation27_spill] sm:$0xff] }
  0x81   :  { %v336_v5 = vadd.f32 %v320_v15, %v288_v21  ;;  %v340_v9 = vadd.f32 %v324_v40, %v292_v2  ;;  %v344_v10 = vadd.f32 %v328_v49, %v296_v19  ;;  %v289_v32 = vand.u32 2147483647, %v273_v4 }
  0x82   :  { %v301_v57 = vsub.f32 %v992_v46, %v991_v41  ;;  %v305_v7 = vsub.f32 %v994_v52, %v993_v50  ;;  %399 = vst [vmem:[#allocation10 + $0x28] sm:$0xff] %v367_v56  ;;  %v293_v34 = vand.u32 2147483647, %v277_v8  ;;  %v309_v14 = vsub.f32 %v996_v54, %v995_v11 }
  0x83   :  { %v368_v20 = vadd.f32 %v336_v5, %v332_v51  ;;  %v313_v17 = vsub.f32 %v825_v18, %v997_v63  ;;  %v297_v62 = vand.u32 2147483647, %v281_v35 }
  0x84   :  { %v317_v3 = vand.u32 2147483647, %v301_v57  ;;  %v321_v30 = vand.u32 2147483647, %v305_v7  ;;  %v325_v42 = vand.u32 2147483647, %v309_v14 }
  0x85   :  { %v369_v59 = vadd.f32 %v368_v20, %v340_v9  ;;  %v329_v39 = vand.u32 2147483647, %v313_v17 }
  0x86   :  { %v333_v31 = vadd.f32 %v317_v3, %v285_v6  ;;  %v337_v60 = vadd.f32 %v321_v30, %v289_v32  ;;  %v341_v0 = vadd.f32 %v325_v42, %v293_v34 }
  0x87   :  { %v370_v37 = vadd.f32 %v369_v59, %v344_v10  ;;  %v345_v23 = vadd.f32 %v329_v39, %v297_v62 }
  0x88   :  { %v371_v12 = vadd.f32 %v337_v60, %v333_v31 }
  0x89   :  { %400 = vst [vmem:[#allocation10 + $0x30] sm:$0xff] %v370_v37 }
  0x8a   :  { %v372_v38 = vadd.f32 %v371_v12, %v341_v0 }
  0x8c   :  { %v373_v1 = vadd.f32 %v372_v38, %v345_v23 }
  0x8e   :  { %401 = vst [vmem:[#allocation10 + $0x38] sm:$0xff] %v373_v1 }
  0x8f   :  { %528 = shalt.err (!%p525_p8)
}
  0x90   :  { %s529_s15 = scalar_lea.hbm %s944_s4, 1024 }
  0x91   :  { %p530_p9 = scmp.ne.s32.totalorder %s944_s4, %s529_s15  ;;  %p533_p10 = scmp.lt.u32.totalorder %s529_s15, %s944_s4 }
  0x93   :  { %p535_p11 = pnand %p533_p10, %p530_p9 }
  0x95   :  { %538 = shalt.err (!%p535_p11)
}
  0x96   :  { %413 = dma.vmem_to_hbm [thread:$0]  %s408_s12, 1024, %s944_s4, [#allocation4], %s549_s27, %s549_s27, %s550_s28  }
  0x97   :  { %545 = dma.done.wait [#allocation4], 1024  }
  0x98   :  { %546 = vsyncadd [#allocation4], 4294966272 }
  0x99   :  { %417 = vsyncpa [#allocation3], 1 }
  0x9a   :  { %418 = vsyncpa [#allocation6], 1 }
  0x9b   :  { %419 = vsyncpa [#allocation9], 1 }
  0x9c   :  { %420 = vsyncpa [#allocation4], 1 }

</bundles_post_ra>
